<compile_context>
chip_gen: v6e
topology: v6e:2x2x1
jax: 0.10.0
libtpu: 0.0.40
codegen_flags: <defaults>
</compile_context>

<pallas_src>
import functools

import jax
import jax.numpy as jnp
from jax.experimental import pallas as pl
from jax.experimental.pallas import tpu as pltpu


# --------------------------------------------------------------------------
# Fused denoiser kernel, transposed (channels-on-sublanes, HW-on-lanes) layout.
#   h_T = SiLU( w1^T @ xt_col^T + (b1 + tbias[b]) )     (hidden, TILE_HW)
#   out =        w2^T @ h_T      +  b2                  (C,      TILE_HW)
# grid = (B, HW // TILE_HW), both "parallel".
# --------------------------------------------------------------------------
def _fused_denoise_kernel(xt_ref, bias_ref, w1t_ref, w2t_ref, b2t_ref, out_ref):
    f32 = jnp.float32
    # 3x3 conv collapsed into one matmul: bf16 operands, f32 accumulation (MXU).
    h = jnp.dot(w1t_ref[...], xt_ref[...], preferred_element_type=f32)  # (hidden, T)
    h = h + bias_ref[...]                       # per-batch (hidden, 1) bias, f32 VPU
    h = h * jax.nn.sigmoid(h)                   # SiLU in f32 (EUP)
    # 1x1 conv: (C, hidden) @ (hidden, T) -> lane-dense (C, T) output.
    out = jnp.dot(w2t_ref[...], h.astype(jnp.bfloat16), preferred_element_type=f32)
    out_ref[...] = (out + b2t_ref[...]).astype(out_ref.dtype)


def fused_forward_call(xt_col, bias_b, w1t, w2t, b2t, *, tile_hw=128):
    B, K9, HW = xt_col.shape
    hidden = w1t.shape[0]
    C = w2t.shape[0]
    if HW % tile_hw != 0:
        tile_hw = HW                           # fall back to a single HW tile
    n_hw = HW // tile_hw

    grid_spec = pltpu.PrefetchScalarGridSpec(
        num_scalar_prefetch=0,
        grid=(B, n_hw),
        in_specs=[
            # xt im2col^T slab, bf16, per (batch, hw-tile)
            pl.BlockSpec((pl.Squeezed(), K9, tile_hw), lambda b, t: (b, 0, t)),
            # folded per-batch bias (b1 + time MLP), f32
            pl.BlockSpec((pl.Squeezed(), hidden, 1), lambda b, t: (b, 0, 0)),
            # weights (grid-invariant)
            pl.BlockSpec((hidden, K9), lambda b, t: (0, 0)),     # w1^T bf16
            pl.BlockSpec((C, hidden), lambda b, t: (0, 0)),      # w2^T bf16
            pl.BlockSpec((C, 1), lambda b, t: (0, 0)),           # b2^T f32
        ],
        out_specs=pl.BlockSpec((pl.Squeezed(), C, tile_hw), lambda b, t: (b, 0, t)),
    )
    return pl.pallas_call(
        _fused_denoise_kernel,
        out_shape=jax.ShapeDtypeStruct((B, C, HW), jnp.float32),
        grid_spec=grid_spec,
        compiler_params=pltpu.CompilerParams(
            dimension_semantics=("parallel", "parallel")),
    )(xt_col, bias_b, w1t, w2t, b2t)


# --------------------------------------------------------------------------
# Glue: schedules, time embedding, im2col, parameter init, end-to-end forward.
# --------------------------------------------------------------------------
def make_ddpm_tables(n_steps):
    betas = jnp.linspace(1e-4, 0.02, n_steps, dtype=jnp.float32)
    alphas = 1.0 - betas
    alpha_bar = jnp.cumprod(alphas)
    return jnp.sqrt(alpha_bar), jnp.sqrt(1.0 - alpha_bar)


def sinusoidal_embedding(t, dim):
    half = dim // 2
    freqs = jnp.exp(-jnp.log(10000.0) *
                    jnp.arange(half, dtype=jnp.float32) / half)
    args = t.astype(jnp.float32)[:, None] * freqs[None, :]
    return jnp.concatenate([jnp.sin(args), jnp.cos(args)], axis=-1)   # (B, dim)


def init_params(key, c_in, hidden, time_dim):
    ks = jax.random.split(key, 4)
    scale = 0.05
    return {
        "wt1": scale * jax.random.normal(ks[0], (time_dim, hidden), jnp.float32),
        "bt1": jnp.zeros((1, hidden), jnp.float32),
        "wt2": scale * jax.random.normal(ks[1], (hidden, hidden), jnp.float32),
        "bt2": jnp.zeros((1, hidden), jnp.float32),
        "w1": scale * jax.random.normal(ks[2], (9, c_in, hidden), jnp.float32),
        "b1": jnp.zeros((1, hidden), jnp.float32),
        "w2": scale * jax.random.normal(ks[3], (hidden, c_in), jnp.float32),
        "b2": jnp.zeros((1, c_in), jnp.float32),
    }


def _im2col_3x3_T(x_img):
    """(B, H, W, C) -> (B, 9*C, H*W): the 9 zero-padded shifted taps
    concatenated along the channel axis in (dy, dx) row-major order
    (tap-major, channel-minor -> matches w1.reshape(9*C, hidden)),
    then transposed so HW is the lane (last) axis."""
    B, H, W, C = x_img.shape
    xpad = jnp.pad(x_img, ((0, 0), (1, 1), (1, 1), (0, 0)))
    slabs = [xpad[:, dy:dy + H, dx:dx + W, :]
             for dy in range(3) for dx in range(3)]
    col = jnp.concatenate(slabs, axis=-1).reshape(B, H * W, 9 * C)
    return jnp.transpose(col, (0, 2, 1))


@functools.partial(jax.jit, static_argnames=("time_dim",))
def diffusion_forward(params, x0_nchw, sample_steps, noise_nchw,
                      sqrt_ab, sqrt_1mab, *, time_dim):
    """Mirrors DiffusionModel.forward (classifier_free=False): returns
    (noise_pred, noise), both NCHW like the PyTorch module."""
    B, C, H, W = x0_nchw.shape
    HW = H * W
    K9 = 9 * C
    hidden = params["w1"].shape[2]

    steps = sample_steps.astype(jnp.int32)
    a_b = sqrt_ab[steps][:, None, None, None]      # sqrt(alpha_bar[t])
    s_b = sqrt_1mab[steps][:, None, None, None]    # sqrt(1 - alpha_bar[t])

    # DDPM q_sample in the wrapper (fuses into the im2col producer), NHWC.
    x0_nhwc = jnp.transpose(x0_nchw, (0, 2, 3, 1))
    nz_nhwc = jnp.transpose(noise_nchw, (0, 2, 3, 1))
    xt_nhwc = a_b * x0_nhwc + s_b * nz_nhwc

    # single bf16 im2col slab, HW on the lane axis: (B, 9C, HW)
    xt_col = _im2col_3x3_T(xt_nhwc).astype(jnp.bfloat16)

    # hoisted time-embedding MLP (M=1 matmuls stay in XLA, not per grid step)
    temb = sinusoidal_embedding(steps, time_dim)
    h_t = temb @ params["wt1"] + params["bt1"]
    h_t = h_t * jax.nn.sigmoid(h_t)
    tbias = h_t @ params["wt2"] + params["bt2"]               # (B, hidden)
    bias_b = (tbias + params["b1"]).reshape(B, hidden, 1)     # folded per-batch bias

    # weight plumbing for the transposed layout
    w1t = params["w1"].reshape(K9, hidden).T.astype(jnp.bfloat16)   # (hidden, 9C)
    w2t = params["w2"].T.astype(jnp.bfloat16)                       # (C, hidden)
    b2t = params["b2"].reshape(C, 1)                                # (C, 1)

    out = fused_forward_call(xt_col, bias_b, w1t, w2t, b2t)   # (B, C, HW)
    noise_pred = out.reshape(B, C, H, W)                      # already NCHW
    return noise_pred, noise_nchw


# Pure-JAX reference (f32 everywhere) for a tolerance check against the
# bf16-operand kernel path.
def _reference_forward(params, x0_nchw, sample_steps, noise_nchw,
                       sqrt_ab, sqrt_1mab, time_dim):
    B, C, H, W = x0_nchw.shape
    steps = sample_steps.astype(jnp.int32)
    a_b = sqrt_ab[steps][:, None, None, None]
    s_b = sqrt_1mab[steps][:, None, None, None]
    xt = a_b * jnp.transpose(x0_nchw, (0, 2, 3, 1)) + \
         s_b * jnp.transpose(noise_nchw, (0, 2, 3, 1))
    xpad = jnp.pad(xt, ((0, 0), (1, 1), (1, 1), (0, 0)))
    slabs = [xpad[:, dy:dy + H, dx:dx + W, :] for dy in range(3) for dx in range(3)]
    xt_col = jnp.concatenate(slabs, axis=-1).reshape(B, H * W, 9 * C)
    temb = sinusoidal_embedding(steps, time_dim)
    h_t = temb @ params["wt1"] + params["bt1"]
    h_t = h_t * jax.nn.sigmoid(h_t)
    tbias = h_t @ params["wt2"] + params["bt2"]
    h = xt_col @ params["w1"].reshape(9 * C, -1) + params["b1"] + tbias[:, None, :]
    h = h * jax.nn.sigmoid(h)
    out = h @ params["w2"] + params["b2"]
    return jnp.transpose(out.reshape(B, H, W, C), (0, 3, 1, 2))


if __name__ == "__main__":
    B, C, H, W = 2, 4, 16, 16          # img_dims = (4, 16, 16)
    n_train_steps = 1000
    hidden = 32
    time_dim = 32

    key = jax.random.PRNGKey(0)
    kx, ksteps, knoise, kparams = jax.random.split(key, 4)

    x0 = jax.random.normal(kx, (B, C, H, W), jnp.float32)   # NCHW, like PyTorch
    params = init_params(kparams, C, hidden, time_dim)
    sqrt_ab, sqrt_1mab = make_ddpm_tables(n_train_steps)

    # forward() with sample_steps=None / noise=None -> draw them here (glue,
    # mirroring torch.randint / torch.randn_like)
    sample_steps = jax.random.randint(ksteps, (B,), 0, n_train_steps, jnp.int32)
    noise = jax.random.normal(knoise, (B, C, H, W), jnp.float32)

    noise_pred, noise_out = diffusion_forward(
        params, x0, sample_steps, noise, sqrt_ab, sqrt_1mab, time_dim=time_dim)
    jax.block_until_ready((noise_pred, noise_out))

    assert noise_pred.shape == x0.shape, noise_pred.shape
    assert noise_out.shape == x0.shape, noise_out.shape
    assert bool(jnp.all(jnp.isfinite(noise_pred)))

    # tolerance check vs pure-f32 reference (kernel matmuls use bf16 operands)
    ref = _reference_forward(params, x0, sample_steps, noise,
                             sqrt_ab, sqrt_1mab, time_dim)
    assert bool(jnp.allclose(noise_pred, ref, atol=5e-2, rtol=5e-2)), \
        float(jnp.max(jnp.abs(noise_pred - ref)))

    print("KERNEL_OK")
</pallas_src>

<mosaic_0001>
module attributes {stable_mosaic.version = 11 : i64} {
  func.func @_fused_denoise_kernel(%arg0: i32, %arg1: i32, %arg2: memref<1x36x128xbf16, #tpu.memory_space<vmem>>, %arg3: memref<1x32x1xf32, #tpu.memory_space<vmem>>, %arg4: memref<32x36xbf16, #tpu.memory_space<vmem>>, %arg5: memref<4x32xbf16, #tpu.memory_space<vmem>>, %arg6: memref<4x1xf32, #tpu.memory_space<vmem>>, %arg7: memref<1x4x128xf32, #tpu.memory_space<vmem>>) attributes {dimension_semantics = [#tpu.dimension_semantics<parallel>, #tpu.dimension_semantics<parallel>], iteration_bounds = array<i64: 2, 2>, scalar_prefetch = 0 : i64, scratch_operands = 0 : i64, tpu.core_type = #tpu.core_type<tc>, window_params = [{transform_indices = @transform_0, window_bounds = array<i64: 1, 36, 128>}, {transform_indices = @transform_1, window_bounds = array<i64: 1, 32, 1>}, {pipeline_mode = #tpu.pipeline_mode<synchronous>, transform_indices = @transform_2, window_bounds = array<i64: 32, 36>}, {pipeline_mode = #tpu.pipeline_mode<synchronous>, transform_indices = @transform_3, window_bounds = array<i64: 4, 32>}, {pipeline_mode = #tpu.pipeline_mode<synchronous>, transform_indices = @transform_4, window_bounds = array<i64: 4, 1>}, {transform_indices = @transform_5, window_bounds = array<i64: 1, 4, 128>}]} {
    %c0 = arith.constant 0 : index
    %c0_0 = arith.constant 0 : index
    %0 = vector.load %arg4[%c0, %c0_0] : memref<32x36xbf16, #tpu.memory_space<vmem>>, vector<32x36xbf16>
    %c0_1 = arith.constant 0 : index
    %c0_2 = arith.constant 0 : index
    %c0_3 = arith.constant 0 : index
    %1 = vector.load %arg2[%c0_1, %c0_2, %c0_3] : memref<1x36x128xbf16, #tpu.memory_space<vmem>>, vector<1x36x128xbf16>
    %2 = vector.shape_cast %1 : vector<1x36x128xbf16> to vector<36x128xbf16>
    %cst = arith.constant dense<0.000000e+00> : vector<32x128xf32>
    %3 = tpu.matmul %0, %2, %cst {dimension_numbers = #tpu.dot_dimension_numbers<[1], [0], [0], [1], [0, 0, 1, 1], [], []>} : vector<32x36xbf16>, vector<36x128xbf16>, vector<32x128xf32> -> vector<32x128xf32>
    %c0_4 = arith.constant 0 : index
    %c0_5 = arith.constant 0 : index
    %c0_6 = arith.constant 0 : index
    %4 = vector.load %arg3[%c0_4, %c0_5, %c0_6] : memref<1x32x1xf32, #tpu.memory_space<vmem>>, vector<1x32x1xf32>
    %5 = vector.shape_cast %4 : vector<1x32x1xf32> to vector<32x1xf32>
    %6 = vector.broadcast %5 : vector<32x1xf32> to vector<32x128xf32>
    %7 = arith.addf %3, %6 : vector<32x128xf32>
    %8 = arith.negf %7 : vector<32x128xf32>
    %9 = math.exp %8 : vector<32x128xf32>
    %cst_7 = arith.constant 1.000000e+00 : f32
    %10 = vector.broadcast %cst_7 : f32 to vector<32x128xf32>
    %11 = arith.addf %10, %9 : vector<32x128xf32>
    %12 = arith.divf %10, %11 : vector<32x128xf32>
    %13 = arith.mulf %7, %12 : vector<32x128xf32>
    %c0_8 = arith.constant 0 : index
    %c0_9 = arith.constant 0 : index
    %14 = vector.load %arg5[%c0_8, %c0_9] : memref<4x32xbf16, #tpu.memory_space<vmem>>, vector<4x32xbf16>
    %15 = arith.truncf %13 : vector<32x128xf32> to vector<32x128xbf16>
    %cst_10 = arith.constant dense<0.000000e+00> : vector<4x128xf32>
    %16 = tpu.matmul %14, %15, %cst_10 {dimension_numbers = #tpu.dot_dimension_numbers<[1], [0], [0], [1], [0, 0, 1, 1], [], []>} : vector<4x32xbf16>, vector<32x128xbf16>, vector<4x128xf32> -> vector<4x128xf32>
    %c0_11 = arith.constant 0 : index
    %c0_12 = arith.constant 0 : index
    %17 = vector.load %arg6[%c0_11, %c0_12] : memref<4x1xf32, #tpu.memory_space<vmem>>, vector<4x1xf32>
    %18 = vector.broadcast %17 : vector<4x1xf32> to vector<4x128xf32>
    %19 = arith.addf %16, %18 : vector<4x128xf32>
    %c0_13 = arith.constant 0 : index
    %c0_14 = arith.constant 0 : index
    %c0_15 = arith.constant 0 : index
    %20 = vector.load %arg7[%c0_13, %c0_14, %c0_15] : memref<1x4x128xf32, #tpu.memory_space<vmem>>, vector<1x4x128xf32>
    %21 = vector.shape_cast %20 : vector<1x4x128xf32> to vector<4x128xf32>
    %22 = vector.shape_cast %19 : vector<4x128xf32> to vector<1x4x128xf32>
    tpu.vector_store %arg7[%c0_13, %c0_14, %c0_15], %22 {strides = array<i32>} : memref<1x4x128xf32, #tpu.memory_space<vmem>>, vector<1x4x128xf32>,
    return
  }
  func.func @transform_0(%arg0: i32, %arg1: i32) -> (i32, i32, i32) {
    %c0_i32 = arith.constant 0 : i32
    %c0_i32_0 = arith.constant 0 : i32
    return %arg0, %c0_i32, %arg1 : i32, i32, i32
  }
  func.func @transform_1(%arg0: i32, %arg1: i32) -> (i32, i32, i32) {
    %c0_i32 = arith.constant 0 : i32
    %c0_i32_0 = arith.constant 0 : i32
    %c0_i32_1 = arith.constant 0 : i32
    return %arg0, %c0_i32, %c0_i32_0 : i32, i32, i32
  }
  func.func @transform_2(%arg0: i32, %arg1: i32) -> (i32, i32) {
    %c0_i32 = arith.constant 0 : i32
    %c0_i32_0 = arith.constant 0 : i32
    %c0_i32_1 = arith.constant 0 : i32
    return %c0_i32, %c0_i32_0 : i32, i32
  }
  func.func @transform_3(%arg0: i32, %arg1: i32) -> (i32, i32) {
    %c0_i32 = arith.constant 0 : i32
    %c0_i32_0 = arith.constant 0 : i32
    %c0_i32_1 = arith.constant 0 : i32
    return %c0_i32, %c0_i32_0 : i32, i32
  }
  func.func @transform_4(%arg0: i32, %arg1: i32) -> (i32, i32) {
    %c0_i32 = arith.constant 0 : i32
    %c0_i32_0 = arith.constant 0 : i32
    %c0_i32_1 = arith.constant 0 : i32
    return %c0_i32, %c0_i32_0 : i32, i32
  }
  func.func @transform_5(%arg0: i32, %arg1: i32) -> (i32, i32, i32) {
    %c0_i32 = arith.constant 0 : i32
    %c0_i32_0 = arith.constant 0 : i32
    return %arg0, %c0_i32, %arg1 : i32, i32, i32
  }
}

</mosaic_0001>

<bundles_post_ra>
// kernel: diffusion_forward.1
= control target key start
LH: loop header
LB: loop body
LE: loop exit
PB: predicated region body
PF: predicated region fallthrough
CT: control target
= control target key end

     0   :  { %s855_s18 = smov 0   ;;  %s857_s19 = smov 0   ;;  %s967_s0 = inlined_call_operand.vmem [shape: bf16[2,36,256], index: 0, kind: input, shape index: {}]   ;;  %s968_s1 = inlined_call_operand.vmem [shape: f32[2,32,1], index: 1, kind: input, shape index: {}]   ;;  %s969_s2 = inlined_call_operand.vmem [shape: bf16[32,36], index: 2, kind: input, shape index: {}]   ;;  %s970_s3 = inlined_call_operand.vmem [shape: bf16[4,32], index: 3, kind: input, shape index: {}]   ;;  %s971_s4 = inlined_call_operand.vmem [shape: f32[4,1], index: 4, kind: input, shape index: {}]   ;;  %s972_s5 = inlined_call_operand.vmem [shape: f32[2,4,256], index: 5, kind: output, shape index: {}]  }
   0x1   :  { %s859_s20 = smov 0   ;;  %s861_s21 = smov 0  }
   0x2   :  { %s863_s22 = smov 0   ;;  %s865_s23 = smov 0  }
   0x3   :  { %s867_s24 = smov 0  }
   0x4 LB: > { %s24_s25 = sadd.s32 1, %s812_s22  ;;  %s27_s26 = sadd.s32 1, %s816_s23  ;;  %s820_s24 = sphi %s867_s24, %s15_s24   ;;  %s816_s23 = sphi %s865_s23, %s978_s23   ;;  %s812_s22 = sphi %s863_s22, %s977_s22   ;;  %s808_s21 = sphi %s861_s21, %s976_s21   ;;  %s804_s20 = sphi %s859_s20, %s975_s20   ;;  %s800_s19 = sphi %s857_s19, %s974_s19   ;;  %s796_s18 = sphi %s855_s18, %s973_s18  }
   0x5   : > { %p25_p0 = scmp.ge.s32.totalorder %s24_s25, 2  ;;  %p43_p1 = scmp.ne.s32.totalorder %s800_s19, %s796_s18 }
   0x6   : > { %p44_p2 = scmp.eq.s32.totalorder %s820_s24, 0  ;;  %s36_s30 = sadd.s32 1, %s800_s19 }
   0x7   : > { %s980_s25 = smov (%p25_p0, %s24_s25), 0  ;;  %s982_s26 = smov (!%p25_p0, %s27_s26), %s816_s23 }
   0x8   : > { %p45_p3 = por %p44_p2, %p43_p1  ;;  %p29_p4 = scmp.ge.s32.totalorder %s982_s26, 2 }
   0x9   : > { %s32_s27 = ssub.s32 %s812_s22, %s980_s25  ;;  %p632_p6 = scmp.ge.s32.totalorder %s820_s24, 4 }
   0xa   : > { %s984_s26 = smov (%p29_p4, %s982_s26), 0 }
   0xb   : > { %s31_s28 = ssub.s32 %s816_s23, %s984_s26  ;;  %195 = sbr.rel (%p632_p6) target bundleno = 26 (0x1a), region = 28 }
   0xc   : > { %s33_s29 = sor.u32 %s32_s27, %s31_s28 }
   0xd   : > { %p34_p5 = scmp.eq.s32.totalorder %s33_s29, 0 }
   0xf   : > { %s906_s6 = scalar_select %p34_p5, %s800_s19, %s36_s30  }
  0x10   : > { %198 = sbr.rel (!%p45_p3) target bundleno = 26 (0x1a), region = 32  ;;  %s200_s7 = sand.u32 (%p45_p3), 1, %s800_s19  }
  0x11   : > { %s682_s8 = smul.u32 (%p45_p3), 10, %s816_s23 }
  0x12   : > { %s681_s9 = smul.u32 (%p45_p3), 20, %s200_s7 }
  0x13   : > { %s204_s10 = sadd.s32 (%p45_p3), %s812_s22, %s682_s8 }
  0x14   : > { %s633_s11 = sshll.u32 (%p45_p3), %s204_s10, 2  ;;  %s202_s15 = scalar_lea.vmem (%p45_p3), [#allocation2], %s681_s9 }
  0x15   : > { %s206_s14 = scalar_lea.vmem %s967_s0, %s633_s11 }
  0x16   : > { %v223_v0 = vld [vmem:[%s206_s14] sm:$0xf]  ;;  %v225_v1 = vld [vmem:[%s206_s14 + $0x8] sm:$0xf]  ;;  %v227_v2 = vld [vmem:[%s206_s14 + $0x10] sm:$0xf] }
  0x17   : > { %224 = vst [vmem:[%s202_s15] sm:$0xf] %v223_v0  ;;  %226 = vst [vmem:[%s202_s15 + $0x4] sm:$0xf] %v225_v1  ;;  %v229_v3 = vld [vmem:[%s206_s14 + $0x18] sm:$0xf] }
  0x18   : > { %228 = vst [vmem:[%s202_s15 + $0x8] sm:$0xf] %v227_v2  ;;  %v231_v4 = vld [vmem:[%s206_s14 + $0x20] sm:$0xf]  ;;  %230 = vst [vmem:[%s202_s15 + $0xc] sm:$0xf] %v229_v3 }
  0x19   : > { %232 = vst [vmem:[%s202_s15 + $0x10] sm:$0xf] %v231_v4 }
  0x1a PF: > { %p634_p7 = scmp.ge.s32.totalorder %s820_s24, 1  ;;  %p273_p8 = scmp.lt.s32.totalorder %s820_s24, 5 }
  0x1c   : > { %p274_p9 = pnand %p634_p7, %p273_p8 }
  0x1d   : > { %s280_s16 = sand.u32 (!%p274_p9), 1, %s796_s18   ;;  %p315_p10 = scmp.lt.s32.totalorder (!%p274_p9), %s808_s21, 1 }
  0x1e   : > { %277 = sbr.rel (%p274_p9) target bundleno = 490 (0x1ea), region = 77  ;;  %p322_p11 = scmp.lt.s32.totalorder (!%p274_p9), %s804_s20, 1 }
  0x1f   : > { %s683_s17 = smul.u32 (!%p274_p9), 20, %s280_s16 }
  0x21   : > { %s282_s29 = scalar_lea.vmem (!%p274_p9), [#allocation2], %s683_s17 }
  0x23   : > { %v748_v5 = vld [vmem:[%s969_s2] sm:$0xff]   ;;  %vm387_vm0 = vcmask 293888   ;;  %vm394_vm1 = vcmask 1041408   ;;  %v822_v6 = vmov 0   ;;  %s986_s21 = smov (!%p315_p10, %s808_s21), 1  ;;  %v749_v15 = vld [vmem:[%s969_s2 + $0x8] sm:$0xff]  }
  0x24   : > { %668 = vmatprep.mubr.msk.bf16.mxu0 %vm387_vm0, %v748_v5  ;;  %743 = vset.pattern.permute.xlu0 %v822_v6  ;;  %v745_v7 = vld [vmem:[%s282_s29 + $0x10] ss:$0 sps:$4 sm:$0x33]   ;;  %v746_v8 = vld [vmem:[%s282_s29 + $0x8] sm:$0xff]   ;;  %v747_v10 = vld [vmem:[%s282_s29] sm:$0xff]   ;;  %s653_s18 = sshll.u32 %s986_s21, 5 }
  0x25   : > { %744 = vset.pattern.permute.xlu1 %v822_v6  ;;  %680 = vmatprep.subr.msk.bf16.mxu0 %vm394_vm1, %v745_v7  ;;  %v396_v9 = vsel %vm394_vm1, %v745_v7, 0  ;;  %s319_s8 = scalar_lea.vmem %s968_s1, %s653_s18  ;;  %v478_v16 = vld [vmem:[%s971_s4] sm:$0xf]  ;;  %v823_v17 = vmov 0.0   ;;  %vm824_vm2 = vmmov 0   ;;  %vm484_vm3 = vcmask 261120  }
  0x26   : > { %663 = vmatpush3.bf16.msra.mxu0 %v396_v9  ;;  %v340_v11 = vld [vmem:[%s319_s8 + $0x10] sm:$0xff]  ;;  %v338_v12 = vld [vmem:[%s319_s8] sm:$0xff]  ;;  %v341_v13 = vld [vmem:[%s319_s8 + $0x18] sm:$0xff]  ;;  %672 = vmatprep.subr.bf16.mxu1 %v823_v17  ;;  %s988_s20 = smov (!%p322_p11, %s804_s20), 1  ;;  %s637_s15 = sshll.u32 %s986_s21, 1 }
  0x27   : > { %664 = vmatprep.subr.bf16.mxu0 %v746_v8  ;;  %354 = vperm.xlu0 %743, %v340_v11   ;;  %v339_v14 = vld [vmem:[%s319_s8 + $0x8] sm:$0xff]  ;;  %v475_v52 = vld [vmem:[%s970_s3] sm:$0x3]  ;;  %s325_s16 = sadd.s32 %s637_s15, %s988_s20 }
  0x28   : > { %344 = vperm.xlu1 %744, %v338_v12   ;;  %676 = vmatprep.mubr.msk.bf16.mxu1 %vm824_vm2, %v823_v17  ;;  %s638_s17 = sshll.u32 %s325_s16, 2 }
  0x29   : > { %s327_s29 = scalar_lea.vmem %s972_s5, %s638_s17 }
  0x2a   : > { %665 = vmatpush3.bf16.msra.mxu0 %v746_v8 }
  0x2b   : > { %666 = vmatprep.subr.bf16.mxu0 %v747_v10  ;;  %359 = vperm.xlu0 %743, %v341_v13  }
  0x2c   : > { %349 = vperm.xlu1 %744, %v339_v14  }
  0x2e   : > { %667 = vmatpush3.bf16.msra.mxu0 %v747_v10 }
  0x2f   : > { %481 = vperm.xlu0 %743, %v478_v16  }
  0x31   : > { %669 = vmatmul.mubr.msk.bf16.vlgmr.msra.gmra.mxu0 %vm387_vm0, %v749_v15 }
  0xa2   : > { %v355_v18 = vpop.permute.xlu0 %354 }
  0xa3   : > { %v345_v19 = vpop.permute.xlu1 %344 }
  0xa6   : > { %v360_v25 = vpop.permute.xlu0 %359 }
  0xa7   : > { %v350_v29 = vpop.permute.xlu1 %349 }
  0xaa   : > { %v482_v53 = vpop.permute.xlu0 %481 }
  0xf1   : > { %v670_v20 = vpop.f32.mrf.mxu0 }
  0xf2   : > { %v441_v21 = vadd.f32 %v670_v20, %v355_v18 }
  0xf3   : > { %v432_v22 = vpop.f32.mrf.mxu0 }
  0xf4   : > { %v648_v23 = vmul.f32 -1.442695, %v441_v21  ;;  %v433_v24 = vadd.f32 %v432_v22, %v345_v19 }
  0xf5   : > { %v671_v26 = vpop.f32.mrf.mxu0 }
  0xf6   : > { %750 = vpow2.f32 %v648_v23  ;;  %v646_v27 = vmul.f32 -1.442695, %v433_v24  ;;  %v444_v28 = vadd.f32 %v671_v26, %v360_v25 }
  0xf7   : > { %v435_v30 = vpop.f32.mrf.mxu0 }
  0xf8   : > { %752 = vpow2.f32 %v646_v27  ;;  %v649_v31 = vmul.f32 -1.442695, %v444_v28  ;;  %v436_v32 = vadd.f32 %v435_v30, %v350_v29 }
  0xfa   : > { %754 = vpow2.f32 %v649_v31  ;;  %v647_v33 = vmul.f32 -1.442695, %v436_v32 }
  0xfc   : > { %756 = vpow2.f32 %v647_v33 }
 0x103   : > { %v751_v34 = vpop.eup %750 }
 0x104   : > { %v461_v35 = vadd.f32 1.0, %v751_v34 }
 0x105   : > { %v753_v36 = vpop.eup %752 }
 0x106   : > { %v459_v38 = vadd.f32 1.0, %v753_v36  ;;  %758 = vrcp.f32 %v461_v35 }
 0x107   : > { %v755_v37 = vpop.eup %754 }
 0x108   : > { %v462_v39 = vadd.f32 1.0, %v755_v37 }
 0x109   : > { %v757_v40 = vpop.eup %756 }
 0x10a   : > { %760 = vrcp.f32 %v462_v39  ;;  %v460_v41 = vadd.f32 1.0, %v757_v40 }
 0x10b   : > { %762 = vrcp.f32 %v459_v38 }
 0x10c   : > { %764 = vrcp.f32 %v460_v41 }
 0x113   : > { %v759_v42 = vpop.eup %758 }
 0x114   : > { %v473_v45 = vmul.f32 %v759_v42, %v441_v21 }
 0x117   : > { %v761_v43 = vpop.eup %760 }
 0x118   : > { %v763_v44 = vpop.eup %762  ;;  %v474_v46 = vmul.f32 %v761_v43, %v444_v28 }
 0x119   : > { %v765_v47 = vpop.eup %764  ;;  %v471_v50 = vmul.f32 %v763_v44, %v433_v24 }
 0x11a   : > { %v472_v48 = vmul.f32 %v765_v47, %v436_v32  ;;  %v477_v49 = vpack.c.bf16 %v474_v46, %v473_v45 }
 0x11c   : > { %673 = vmatpush3.bf16.msra.mxu1 %v477_v49  ;;  %v476_v51 = vpack.c.bf16 %v472_v48, %v471_v50 }
 0x11d   : > { %674 = vmatprep.subr.bf16.mxu1 %v823_v17 }
 0x120   : > { %675 = vmatpush3.bf16.msra.mxu1 %v476_v51 }
 0x123   : > { %677 = vmatmul.mubr.msk.bf16.vlgmr.msra.gmra.mxu1 %vm484_vm3, %v475_v52 }
 0x1e3   : > { %v522_v54 = vpop.f32.mrf.mxu1 }
 0x1e4   : > { %v523_v55 = vadd.f32 %v522_v54, %v482_v53 }
 0x1e5   : > { %v678_v56 = vpop.f32.mrf.mxu1 }
 0x1e6   : > { %528 = vst [vmem:[%s327_s29] sm:$0xf] %v523_v55 }
 0x1e7   : > { %v525_v57 = vpop.f32.mrf.mxu1 }
 0x1e9   : > { %v679_v58 = vpop.f32.mrf.mxu1 }
 0x1ea PF: > { %s15_s24 = sadd.s32 1, %s820_s24   ;;  %s973_s18 = smov %s800_s19 }
 0x1eb   : > { %p12_p12 = scmp.ge.s32.totalorder %s15_s24, 6   ;;  %s974_s19 = smov %s906_s6 }
 0x1ec   : > { %s975_s20 = smov %s812_s22  ;;  %s976_s21 = smov %s816_s23 }
 0x1ed   : > { %s977_s22 = smov %s980_s25  ;;  %s978_s23 = smov %s984_s26 }
 0x1ee   :  { %14 = sbr.rel (!%p12_p12) target bundleno = 4 (0x4), region = 119 }

</bundles_post_ra>
